<compile_context>
chip_gen: v6e
topology: v6e:2x2x1
jax: 0.10.0
libtpu: 0.0.40
codegen_flags: <defaults>
</compile_context>

<pallas_src>
import functools

import jax
import jax.numpy as jnp
from jax.experimental import pallas as pl
from jax.experimental.pallas import tpu as pltpu


def _round_up(n, m):
    return ((n + m - 1) // m) * m


def classifier_kernel(x_ref, w1_ref, b1_ref, w2_ref, b2_ref, w3_ref, b3_ref,
                      logits_ref, feat_ref):
    # fc1 + ReLU (dropout = identity at inference).
    # x arrives f32 over the (narrow) DMA path; cast to bf16 just before the
    # MXU dot. Accumulation in f32; all elementwise math stays f32.
    x = x_ref[...].astype(w1_ref.dtype)
    h1 = jnp.dot(x, w1_ref[...], preferred_element_type=jnp.float32)
    h1 = jnp.maximum(h1 + b1_ref[...], 0.0)

    # fc2 + ReLU -> feat (returned in f32).
    feat = jnp.dot(h1.astype(w2_ref.dtype), w2_ref[...],
                   preferred_element_type=jnp.float32)
    feat = jnp.maximum(feat + b2_ref[...], 0.0)
    feat_ref[...] = feat

    # fc3 applied to feat (reference semantics). Narrow (num_classes-wide)
    # store: masked vst, but far fewer HBM write bytes than a 128-lane pad.
    logits = jnp.dot(feat.astype(w3_ref.dtype), w3_ref[...],
                     preferred_element_type=jnp.float32)
    logits_ref[...] = logits + b3_ref[...]


@functools.partial(jax.jit, static_argnames=("block_batch",))
def custom_classifier_forward(x, w1, b1, w2, b2, w3, b3, *, block_batch=1024):
    batch, in_features = x.shape
    h1_dim = w1.shape[1]       # 512
    h2_dim = w2.shape[1]       # 128
    num_classes = w3.shape[1]

    f32, bf16 = jnp.float32, jnp.bfloat16

    # Batch tile: multiple of 16 (bf16 sublane packing). For large batches cap
    # the tile so the grid has >=4 steps (both v7x TensorCores get work); for
    # tiny batches don't exceed the 8-rounded batch (avoids useless padding).
    tb = min(block_batch, _round_up(pl.cdiv(batch, 4), 16))
    tb = max(8, min(tb, _round_up(batch, 8)))
    grid = (pl.cdiv(batch, tb),)

    # Weights are cast to bf16 once in the wrapper (~0.3 MiB total, resident
    # in VMEM for the whole grid). x stays f32 / unpadded.
    w1b = w1.astype(bf16)
    w2b = w2.astype(bf16)
    w3b = w3.astype(bf16)
    b1f = b1.reshape(1, h1_dim).astype(f32)
    b2f = b2.reshape(1, h2_dim).astype(f32)
    b3f = b3.reshape(1, num_classes).astype(f32)

    flops = 2 * batch * (in_features * h1_dim + h1_dim * h2_dim
                         + h2_dim * num_classes)
    bytes_accessed = (x.size * 4
                      + (w1b.size + w2b.size + w3b.size) * 2
                      + (b1f.size + b2f.size + b3f.size) * 4
                      + batch * (num_classes + h2_dim) * 4)

    logits, feat = pl.pallas_call(
        classifier_kernel,
        out_shape=(
            jax.ShapeDtypeStruct((batch, num_classes), f32),  # logits (narrow)
            jax.ShapeDtypeStruct((batch, h2_dim), f32),       # feat
        ),
        grid=grid,
        in_specs=[
            # x: pipelined batch tiles; last dim == full array dim (legal even
            # though < 128), so no lane padding / pre-cast pass is needed.
            pl.BlockSpec((tb, in_features), lambda i: (i, 0)),
            pl.BlockSpec((in_features, h1_dim), lambda i: (0, 0)),  # w1 resident
            pl.BlockSpec((1, h1_dim), lambda i: (0, 0)),            # b1 resident
            pl.BlockSpec((h1_dim, h2_dim), lambda i: (0, 0)),       # w2 resident
            pl.BlockSpec((1, h2_dim), lambda i: (0, 0)),            # b2 resident
            pl.BlockSpec((h2_dim, num_classes), lambda i: (0, 0)),  # w3 resident
            pl.BlockSpec((1, num_classes), lambda i: (0, 0)),       # b3 resident
        ],
        out_specs=(
            pl.BlockSpec((tb, num_classes), lambda i: (i, 0)),
            pl.BlockSpec((tb, h2_dim), lambda i: (i, 0)),
        ),
        compiler_params=pltpu.CompilerParams(
            dimension_semantics=("parallel",),
            vmem_limit_bytes=32 * 1024 * 1024,   # sized against v7x's 64 MiB/TC
        ),
        cost_estimate=pl.CostEstimate(
            flops=flops, transcendentals=0, bytes_accessed=bytes_accessed),
    )(x, w1b, b1f, w2b, b2f, w3b, b3f)

    return logits, feat


def init_params(key, in_features, num_classes):
    """Deterministic synthetic parameters matching the nn.Module shapes."""
    k1, k2, k3, k4, k5, k6 = jax.random.split(key, 6)
    # Stored as (in, out): transpose of PyTorch nn.Linear weights.
    w1 = jax.random.normal(k1, (in_features, 512), jnp.float32) * 0.05
    b1 = jax.random.normal(k2, (1, 512), jnp.float32) * 0.01
    w2 = jax.random.normal(k3, (512, 128), jnp.float32) * 0.05
    b2 = jax.random.normal(k4, (1, 128), jnp.float32) * 0.01
    w3 = jax.random.normal(k5, (128, num_classes), jnp.float32) * 0.05
    b3 = jax.random.normal(k6, (1, num_classes), jnp.float32) * 0.01
    return w1, b1, w2, b2, w3, b3


def _reference(x, params):
    """Pure-JAX f32 reference (eval-mode dropout == identity)."""
    w1, b1, w2, b2, w3, b3 = params
    h1 = jnp.maximum(x @ w1 + b1, 0.0)
    feat = jnp.maximum(h1 @ w2 + b2, 0.0)
    logits = feat @ w3 + b3
    return logits, feat


if __name__ == "__main__":
    in_features = 32
    num_classes = 10

    key = jax.random.PRNGKey(0)
    kx, kx2, kp = jax.random.split(key, 3)
    params = init_params(kp, in_features, num_classes)

    # Test 1: small batch, single exact grid step.
    batch = 8
    x = jax.random.normal(kx, (batch, in_features), jnp.float32)
    logits, feat = custom_classifier_forward(x, *params)
    jax.block_until_ready((logits, feat))

    logits_ref, feat_ref = _reference(x, params)
    assert logits.shape == (batch, num_classes)
    assert feat.shape == (batch, 128)
    # bf16 MXU inputs -> widened tolerances vs the f32 reference.
    assert jnp.allclose(logits, logits_ref, atol=2e-2, rtol=2e-2)
    assert jnp.allclose(feat, feat_ref, atol=2e-2, rtol=2e-2)

    # Test 2: multi-step grid with a partial (non-divisible) last batch tile.
    batch2 = 24
    x2 = jax.random.normal(kx2, (batch2, in_features), jnp.float32)
    logits2, feat2 = custom_classifier_forward(x2, *params)
    jax.block_until_ready((logits2, feat2))

    logits2_ref, feat2_ref = _reference(x2, params)
    assert logits2.shape == (batch2, num_classes)
    assert feat2.shape == (batch2, 128)
    assert jnp.allclose(logits2, logits2_ref, atol=2e-2, rtol=2e-2)
    assert jnp.allclose(feat2, feat2_ref, atol=2e-2, rtol=2e-2)

    print("KERNEL_OK")
</pallas_src>

<mosaic_0001>
module attributes {stable_mosaic.version = 11 : i64} {
  func.func @classifier_kernel(%arg0: i32, %arg1: memref<8x32xf32, #tpu.memory_space<vmem>>, %arg2: memref<32x512xbf16, #tpu.memory_space<vmem>>, %arg3: memref<1x512xf32, #tpu.memory_space<vmem>>, %arg4: memref<512x128xbf16, #tpu.memory_space<vmem>>, %arg5: memref<1x128xf32, #tpu.memory_space<vmem>>, %arg6: memref<128x10xbf16, #tpu.memory_space<vmem>>, %arg7: memref<1x10xf32, #tpu.memory_space<vmem>>, %arg8: memref<8x10xf32, #tpu.memory_space<vmem>>, %arg9: memref<8x128xf32, #tpu.memory_space<vmem>>) attributes {dimension_semantics = [#tpu.dimension_semantics<parallel>], iteration_bounds = array<i64: 1>, scalar_prefetch = 0 : i64, scratch_operands = 0 : i64, tpu.core_type = #tpu.core_type<tc>, window_params = [{transform_indices = @transform_0, window_bounds = array<i64: 8, 32>}, {pipeline_mode = #tpu.pipeline_mode<synchronous>, transform_indices = @transform_1, window_bounds = array<i64: 32, 512>}, {pipeline_mode = #tpu.pipeline_mode<synchronous>, transform_indices = @transform_2, window_bounds = array<i64: 1, 512>}, {pipeline_mode = #tpu.pipeline_mode<synchronous>, transform_indices = @transform_3, window_bounds = array<i64: 512, 128>}, {pipeline_mode = #tpu.pipeline_mode<synchronous>, transform_indices = @transform_4, window_bounds = array<i64: 1, 128>}, {pipeline_mode = #tpu.pipeline_mode<synchronous>, transform_indices = @transform_5, window_bounds = array<i64: 128, 10>}, {pipeline_mode = #tpu.pipeline_mode<synchronous>, transform_indices = @transform_6, window_bounds = array<i64: 1, 10>}, {transform_indices = @transform_7, window_bounds = array<i64: 8, 10>}, {transform_indices = @transform_8, window_bounds = array<i64: 8, 128>}]} {
    %c0 = arith.constant 0 : index
    %c0_0 = arith.constant 0 : index
    %0 = vector.load %arg1[%c0, %c0_0] : memref<8x32xf32, #tpu.memory_space<vmem>>, vector<8x32xf32>
    %1 = arith.truncf %0 : vector<8x32xf32> to vector<8x32xbf16>
    %c0_1 = arith.constant 0 : index
    %c0_2 = arith.constant 0 : index
    %2 = vector.load %arg2[%c0_1, %c0_2] : memref<32x512xbf16, #tpu.memory_space<vmem>>, vector<32x512xbf16>
    %cst = arith.constant dense<0.000000e+00> : vector<8x512xf32>
    %3 = tpu.matmul %1, %2, %cst {dimension_numbers = #tpu.dot_dimension_numbers<[1], [0], [0], [1], [0, 0, 1, 1], [], []>} : vector<8x32xbf16>, vector<32x512xbf16>, vector<8x512xf32> -> vector<8x512xf32>
    %c0_3 = arith.constant 0 : index
    %c0_4 = arith.constant 0 : index
    %4 = vector.load %arg3[%c0_3, %c0_4] : memref<1x512xf32, #tpu.memory_space<vmem>>, vector<1x512xf32>
    %5 = vector.broadcast %4 : vector<1x512xf32> to vector<8x512xf32>
    %6 = arith.addf %3, %5 : vector<8x512xf32>
    %cst_5 = arith.constant 0.000000e+00 : f32
    %7 = vector.broadcast %cst_5 : f32 to vector<8x512xf32>
    %8 = arith.maximumf %6, %7 : vector<8x512xf32>
    %9 = arith.truncf %8 : vector<8x512xf32> to vector<8x512xbf16>
    %c0_6 = arith.constant 0 : index
    %c0_7 = arith.constant 0 : index
    %10 = vector.load %arg4[%c0_6, %c0_7] : memref<512x128xbf16, #tpu.memory_space<vmem>>, vector<512x128xbf16>
    %cst_8 = arith.constant dense<0.000000e+00> : vector<8x128xf32>
    %11 = tpu.matmul %9, %10, %cst_8 {dimension_numbers = #tpu.dot_dimension_numbers<[1], [0], [0], [1], [0, 0, 1, 1], [], []>} : vector<8x512xbf16>, vector<512x128xbf16>, vector<8x128xf32> -> vector<8x128xf32>
    %c0_9 = arith.constant 0 : index
    %c0_10 = arith.constant 0 : index
    %12 = vector.load %arg5[%c0_9, %c0_10] : memref<1x128xf32, #tpu.memory_space<vmem>>, vector<1x128xf32>
    %13 = vector.broadcast %12 : vector<1x128xf32> to vector<8x128xf32>
    %14 = arith.addf %11, %13 : vector<8x128xf32>
    %cst_11 = arith.constant 0.000000e+00 : f32
    %15 = vector.broadcast %cst_11 : f32 to vector<8x128xf32>
    %16 = arith.maximumf %14, %15 : vector<8x128xf32>
    %c0_12 = arith.constant 0 : index
    %c0_13 = arith.constant 0 : index
    %17 = vector.load %arg9[%c0_12, %c0_13] : memref<8x128xf32, #tpu.memory_space<vmem>>, vector<8x128xf32>
    tpu.vector_store %arg9[%c0_12, %c0_13], %16 {strides = array<i32>} : memref<8x128xf32, #tpu.memory_space<vmem>>, vector<8x128xf32>,
    %18 = arith.truncf %16 : vector<8x128xf32> to vector<8x128xbf16>
    %c0_14 = arith.constant 0 : index
    %c0_15 = arith.constant 0 : index
    %19 = vector.load %arg6[%c0_14, %c0_15] : memref<128x10xbf16, #tpu.memory_space<vmem>>, vector<128x10xbf16>
    %cst_16 = arith.constant dense<0.000000e+00> : vector<8x10xf32>
    %20 = tpu.matmul %18, %19, %cst_16 {dimension_numbers = #tpu.dot_dimension_numbers<[1], [0], [0], [1], [0, 0, 1, 1], [], []>} : vector<8x128xbf16>, vector<128x10xbf16>, vector<8x10xf32> -> vector<8x10xf32>
    %c0_17 = arith.constant 0 : index
    %c0_18 = arith.constant 0 : index
    %21 = vector.load %arg7[%c0_17, %c0_18] : memref<1x10xf32, #tpu.memory_space<vmem>>, vector<1x10xf32>
    %22 = vector.broadcast %21 : vector<1x10xf32> to vector<8x10xf32>
    %23 = arith.addf %20, %22 : vector<8x10xf32>
    %c0_19 = arith.constant 0 : index
    %c0_20 = arith.constant 0 : index
    %24 = vector.load %arg8[%c0_19, %c0_20] : memref<8x10xf32, #tpu.memory_space<vmem>>, vector<8x10xf32>
    tpu.vector_store %arg8[%c0_19, %c0_20], %23 {strides = array<i32>} : memref<8x10xf32, #tpu.memory_space<vmem>>, vector<8x10xf32>,
    return
  }
  func.func @transform_0(%arg0: i32) -> (i32, i32) {
    %c0_i32 = arith.constant 0 : i32
    %c0_i32_0 = arith.constant 0 : i32
    return %arg0, %c0_i32 : i32, i32
  }
  func.func @transform_1(%arg0: i32) -> (i32, i32) {
    %c0_i32 = arith.constant 0 : i32
    %c0_i32_0 = arith.constant 0 : i32
    %c0_i32_1 = arith.constant 0 : i32
    return %c0_i32, %c0_i32_0 : i32, i32
  }
  func.func @transform_2(%arg0: i32) -> (i32, i32) {
    %c0_i32 = arith.constant 0 : i32
    %c0_i32_0 = arith.constant 0 : i32
    %c0_i32_1 = arith.constant 0 : i32
    return %c0_i32, %c0_i32_0 : i32, i32
  }
  func.func @transform_3(%arg0: i32) -> (i32, i32) {
    %c0_i32 = arith.constant 0 : i32
    %c0_i32_0 = arith.constant 0 : i32
    %c0_i32_1 = arith.constant 0 : i32
    return %c0_i32, %c0_i32_0 : i32, i32
  }
  func.func @transform_4(%arg0: i32) -> (i32, i32) {
    %c0_i32 = arith.constant 0 : i32
    %c0_i32_0 = arith.constant 0 : i32
    %c0_i32_1 = arith.constant 0 : i32
    return %c0_i32, %c0_i32_0 : i32, i32
  }
  func.func @transform_5(%arg0: i32) -> (i32, i32) {
    %c0_i32 = arith.constant 0 : i32
    %c0_i32_0 = arith.constant 0 : i32
    %c0_i32_1 = arith.constant 0 : i32
    return %c0_i32, %c0_i32_0 : i32, i32
  }
  func.func @transform_6(%arg0: i32) -> (i32, i32) {
    %c0_i32 = arith.constant 0 : i32
    %c0_i32_0 = arith.constant 0 : i32
    %c0_i32_1 = arith.constant 0 : i32
    return %c0_i32, %c0_i32_0 : i32, i32
  }
  func.func @transform_7(%arg0: i32) -> (i32, i32) {
    %c0_i32 = arith.constant 0 : i32
    %c0_i32_0 = arith.constant 0 : i32
    return %arg0, %c0_i32 : i32, i32
  }
  func.func @transform_8(%arg0: i32) -> (i32, i32) {
    %c0_i32 = arith.constant 0 : i32
    %c0_i32_0 = arith.constant 0 : i32
    return %arg0, %c0_i32 : i32, i32
  }
}

</mosaic_0001>

<bundles_post_ra>
// kernel: custom_classifier_forward.1
= control target key start
LH: loop header
LB: loop body
LE: loop exit
PB: predicated region body
PF: predicated region fallthrough
CT: control target
= control target key end

     0   :  { %14 = vsyncpa [#allocation3], 0  ;;  %v910_v2 = vmov 0   ;;  %vm103_vm0 = vcmask 261120   ;;  %s1124_s0 = inlined_call_operand.vmem [shape: f32[8,32], index: 0, kind: input, shape index: {}]   ;;  %s1125_s1 = inlined_call_operand.vmem [shape: bf16[32,512], index: 1, kind: input, shape index: {}]   ;;  %s1126_s2 = inlined_call_operand.vmem [shape: f32[1,512], index: 2, kind: input, shape index: {}]   ;;  %s1127_s3 = inlined_call_operand.vmem [shape: bf16[512,128], index: 3, kind: input, shape index: {}]   ;;  %s1128_s4 = inlined_call_operand.vmem [shape: f32[1,128], index: 4, kind: input, shape index: {}]   ;;  %s1129_s5 = inlined_call_operand.vmem [shape: bf16[128,10], index: 5, kind: input, shape index: {}]   ;;  %s1130_s6 = inlined_call_operand.vmem [shape: f32[1,10], index: 6, kind: input, shape index: {}]   ;;  %s1131_s7 = inlined_call_operand.hbm [shape: f32[8,10], index: 7, kind: output, shape index: {0}]   ;;  %s1132_s8 = inlined_call_operand.hbm [shape: f32[8,128], index: 8, kind: output, shape index: {1}]  }
   0x1   :  { %v814_v0 = vld [vmem:[%s1125_s1 + $0x24] ss:$16 sps:$4 sm:$0xff]   ;;  %v816_v1 = vld [vmem:[%s1125_s1 + $0x20] ss:$16 sps:$4 sm:$0xff]   ;;  %139 = vmatprep.mubr.bf16.mxu1 %v910_v2  ;;  %v822_v6 = vld [vmem:[%s1125_s1 + $0x2c] ss:$16 sps:$4 sm:$0xff]  }
   0x2   :  { %119 = vmatprep.subr.bf16.mxu1 %v814_v0  ;;  %v817_v3 = vld [vmem:[%s1125_s1 + $0x4] ss:$16 sps:$4 sm:$0xff]   ;;  %v819_v4 = vld [vmem:[%s1125_s1] ss:$16 sps:$4 sm:$0xff]   ;;  %v820_v7 = vld [vmem:[%s1125_s1 + $0x28] ss:$16 sps:$4 sm:$0xff]  }
   0x3   :  { %120 = vmatpush1.bf16.msra.mxu1 %v816_v1  ;;  %v31_v5 = vld [vmem:[%s1124_s0] sm:$0xff]  ;;  %v825_v9 = vld [vmem:[%s1125_s1 + $0xc] ss:$16 sps:$4 sm:$0xff]   ;;  %v828_v12 = vld [vmem:[%s1127_s3 + $0x70] sm:$0xff]  }
   0x4   :  { %121 = vmatprep.subr.bf16.mxu1 %v817_v3  ;;  %v32_v8 = vpack.c.bf16 %v31_v5, %v31_v5  ;;  %v826_v10 = vld [vmem:[%s1127_s3 + $0x78] sm:$0xff]   ;;  %v829_v13 = vld [vmem:[%s1127_s3 + $0x30] sm:$0xff]   ;;  %v830_v14 = vld [vmem:[%s1127_s3 + $0x68] sm:$0xff]  }
   0x5   :  { %v827_v11 = vld [vmem:[%s1127_s3 + $0x38] sm:$0xff]   ;;  %736 = vmatprep.subr.bf16.mxu0 %v826_v10  ;;  %v832_v17 = vld [vmem:[%s1127_s3 + $0x28] sm:$0xff]   ;;  %v834_v18 = vld [vmem:[%s1127_s3 + $0x60] sm:$0xff]  }
   0x6   :  { %737 = vmatpush3.bf16.msra.mxu0 %v827_v11  ;;  %v823_v15 = vld [vmem:[%s1125_s1 + $0x8] ss:$16 sps:$4 sm:$0xff]   ;;  %v835_v20 = vld [vmem:[%s1127_s3 + $0xf0] sm:$0xff]   ;;  %v836_v21 = vld [vmem:[%s1127_s3 + $0x20] sm:$0xff]  }
   0x7   :  { %122 = vmatpush1.bf16.msra.mxu1 %v819_v4  ;;  %738 = vmatprep.subr.bf16.mxu0 %v828_v12  ;;  %v831_v16 = vld [vmem:[%s1127_s3 + $0xf8] sm:$0xff]   ;;  %v837_v23 = vld [vmem:[%s1127_s3 + $0xb0] sm:$0xff]   ;;  %v839_v24 = vld [vmem:[%s1127_s3 + $0xe8] sm:$0xff]  }
   0x8   :  { %160 = vmatprep.subr.bf16.mxu1 %v822_v6  ;;  %v833_v19 = vld [vmem:[%s1127_s3 + $0xb8] sm:$0xff]   ;;  %v842_v26 = vld [vmem:[%s1127_s3 + $0x50] sm:$0xff]   ;;  %v841_v27 = vld [vmem:[%s1127_s3 + $0xa8] sm:$0xff]  }
   0x9   :  { %v838_v22 = vld [vmem:[%s1127_s3 + $0x58] sm:$0xff]   ;;  %v843_v28 = vld [vmem:[%s1127_s3 + $0xe0] sm:$0xff]   ;;  %v844_v29 = vld [vmem:[%s1127_s3 + $0x10] sm:$0xff]  }
   0xa   :  { %692 = vmatmul.mubr.msk.bf16.vlgmr.msra.gmra.mxu1 %vm103_vm0, %v32_v8  ;;  %739 = vmatpush3.bf16.msra.mxu0 %v829_v13  ;;  %v840_v25 = vld [vmem:[%s1127_s3 + $0x18] sm:$0xff]   ;;  %v845_v30 = vld [vmem:[%s1127_s3 + $0xa0] sm:$0xff]  }
   0xb   :  { %161 = vmatpush1.bf16.msra.mxu1 %v820_v7  ;;  %180 = vmatprep.mubr.bf16.mxu1 %v910_v2 }
   0xc   :  { %162 = vmatprep.subr.bf16.mxu1 %v825_v9  ;;  %740 = vmatprep.subr.bf16.mxu0 %v830_v14 }
   0xe   :  { %741 = vmatpush3.bf16.msra.mxu0 %v832_v17 }
   0xf   :  { %163 = vmatpush1.bf16.msra.mxu1 %v823_v15  ;;  %742 = vmatprep.subr.bf16.mxu0 %v834_v18 }
  0x10   :  { %758 = vmatprep.subr.bf16.mxu1 %v831_v16 }
  0x12   :  { %693 = vmatmul.mubr.msk.bf16.vlgmr.msra.gmra.mxu1 %vm103_vm0, %v32_v8  ;;  %743 = vmatpush3.bf16.msra.mxu0 %v836_v21 }
  0x13   :  { %759 = vmatpush3.bf16.msra.mxu1 %v833_v19  ;;  %744 = vmatprep.subr.bf16.mxu0 %v838_v22 }
  0x14   :  { %760 = vmatprep.subr.bf16.mxu1 %v835_v20 }
  0x16   :  { %745 = vmatpush3.bf16.msra.mxu0 %v840_v25 }
  0x17   :  { %761 = vmatpush3.bf16.msra.mxu1 %v837_v23  ;;  %746 = vmatprep.subr.bf16.mxu0 %v842_v26 }
  0x18   :  { %762 = vmatprep.subr.bf16.mxu1 %v839_v24 }
  0x1a   :  { %747 = vmatpush3.bf16.msra.mxu0 %v844_v29 }
  0x1b   :  { %763 = vmatpush3.bf16.msra.mxu1 %v841_v27 }
  0x1c   :  { %764 = vmatprep.subr.bf16.mxu1 %v843_v28 }
  0x1f   :  { %765 = vmatpush3.bf16.msra.mxu1 %v845_v30 }
  0x20   :  { %15 = vsyncpa [#allocation5], 0  ;;  %v846_v31 = vld [vmem:[%s1127_s3 + $0x48] sm:$0xff]   ;;  %v847_v32 = vld [vmem:[%s1127_s3 + $0xd8] sm:$0xff]   ;;  %v911_v43 = vmov 0.0   ;;  %v43_v44 = vlaneseq  ;;  %vm912_vm1 = vmmov 0  }
  0x21   :  { %v848_v33 = vld [vmem:[%s1127_s3 + $0x8] sm:$0xff]   ;;  %v849_v34 = vld [vmem:[%s1127_s3 + $0x98] sm:$0xff]   ;;  %748 = vmatprep.subr.bf16.mxu0 %v846_v31  ;;  %766 = vmatprep.subr.bf16.mxu1 %v847_v32  ;;  %v850_v35 = vld [vmem:[%s1127_s3 + $0x40] sm:$0xff]  }
  0x22   :  { %749 = vmatpush3.bf16.msra.mxu0 %v848_v33  ;;  %v851_v36 = vld [vmem:[%s1127_s3 + $0xd0] sm:$0xff]   ;;  %v852_v37 = vld [vmem:[%s1127_s3] sm:$0xff]   ;;  %v854_v39 = vld [vmem:[%s1127_s3 + $0xc8] sm:$0xff]   ;;  %v44_v45 = vshrl.u32 %v43_v44, 7 }
  0x23   :  { %767 = vmatpush3.bf16.msra.mxu1 %v849_v34  ;;  %v853_v38 = vld [vmem:[%s1127_s3 + $0x90] sm:$0xff]   ;;  %750 = vmatprep.subr.bf16.mxu0 %v850_v35  ;;  %v855_v40 = vld [vmem:[%s1127_s3 + $0x88] sm:$0xff]   ;;  %v856_v41 = vld [vmem:[%s1127_s3 + $0xc0] sm:$0xff]  }
  0x24   :  { %768 = vmatprep.subr.bf16.mxu1 %v851_v36  ;;  %v857_v42 = vld [vmem:[%s1127_s3 + $0x80] sm:$0xff]   ;;  %v45_v46 = vsub.s32 0, %v44_v45  ;;  %v49_v48 = vsub.s32 1, %v44_v45  ;;  %v53_v53 = vsub.s32 2, %v44_v45  ;;  %v57_v56 = vsub.s32 3, %v44_v45  ;;  %v858_v0 = vld [vmem:[%s1129_s5 + $0x38] sm:$0xff]  }
  0x25   :  { %v41_v47 = vld [vmem:[%s1126_s2] sm:$0xf]  ;;  %v859_v6 = vld [vmem:[%s1129_s5 + $0x30] sm:$0xff]   ;;  %v860_v12 = vld [vmem:[%s1129_s5 + $0x28] sm:$0xff]  }
  0x26   :  { %751 = vmatpush3.bf16.msra.mxu0 %v852_v37  ;;  %v46_v49 = vrot.slane %v41_v47, %v45_v46  ;;  %v50_v50 = vrot.slane %v41_v47, %v49_v48  ;;  %v54_v59 = vrot.slane %v41_v47, %v53_v53  ;;  %v58_v63 = vrot.slane %v41_v47, %v57_v56  ;;  %v861_v14 = vld [vmem:[%s1129_s5 + $0x20] sm:$0xff]   ;;  %v862_v15 = vld [vmem:[%s1129_s5 + $0x18] sm:$0xff]   ;;  %v863_v16 = vld [vmem:[%s1129_s5 + $0x10] sm:$0xff]  }
  0x27   :  { %769 = vmatpush3.bf16.msra.mxu1 %v853_v38  ;;  %789 = vmatprep.subr.bf16.mxu0 %v911_v43  ;;  %v864_v17 = vld [vmem:[%s1129_s5 + $0x8] sm:$0xff]   ;;  %v865_v18 = vld [vmem:[%s1129_s5] sm:$0xff]   ;;  %s913_s5 = smov [#allocation4]  }
  0x28   :  { %770 = vmatprep.subr.bf16.mxu1 %v854_v39  ;;  %v694_v24 = vld [vmem:[%s1128_s4] ss:$0 sm:$0xff]  ;;  %s672_s10 = sshll.u32 %s913_s5, 4  ;;  %s673_s10 = int_to_ptr.vmem [resolvable:$true] %s672_s10 }
  0x29   :  { %s866_s11 = scalar_lea.vmem %s673_s10, 128  ;;  %p871_p1 = scmp.lt.s32.totalorder %s673_s10, %s673_s10 }
  0x2a   :  { %p867_p0 = scmp.ne.s32.totalorder %s673_s10, %s866_s11  ;;  %p872_p2 = scmp.lt.s32.totalorder %s866_s11, %s866_s11 }
  0x2b   :  { %771 = vmatpush3.bf16.msra.mxu1 %v855_v40 }
  0x2c   :  { %772 = vmatprep.subr.bf16.mxu1 %v856_v41  ;;  %p873_p3 = por %p872_p2, %p871_p1 }
  0x2e   :  { %p874_p4 = pnand %p873_p3, %p867_p0 }
  0x2f   :  { %773 = vmatpush3.bf16.msra.mxu1 %v857_v42 }
  0xca   :  { %v141_v51 = vpop.f32.mrf.mxu1 }
  0xcb   :  { %v142_v52 = vadd.f32 %v141_v51, %v46_v49 }
  0xcc   :  { %v143_v54 = vpop.f32.mrf.mxu1 }
  0xcd   :  { %v144_v55 = vadd.f32 %v143_v54, %v50_v50  ;;  %v189_v57 = vmax.f32 %v142_v52, 0.0 }
  0xce   :  { %v145_v58 = vpop.f32.mrf.mxu1 }
  0xcf   :  { %v190_v60 = vmax.f32 %v144_v55, 0.0  ;;  %v193_v1 = vpack.c.bf16 %v189_v57, %v189_v57 }
  0xd0   :  { %v146_v61 = vpop.f32.mrf.mxu1 }
  0xd1   :  { %v194_v62 = vpack.c.bf16 %v190_v60, %v190_v60 }
  0xd2   :  { %v182_v2 = vpop.f32.mrf.mxu1 }
  0xd3   :  { %v183_v3 = vadd.f32 %v182_v2, %v54_v59  ;;  %492 = vmatprep.mubr.bf16.mxu0 %v194_v62 }
  0xd4   :  { %v184_v4 = vpop.f32.mrf.mxu1  ;;  %493 = vmatmul.mubr.bf16.vlgmr.msra.gmra.mxu0 %v193_v1 }
  0xd5   :  { %v185_v5 = vadd.f32 %v184_v4, %v58_v63  ;;  %790 = vmatpush3.bf16.msra.mxu0 %v858_v0  ;;  %v191_v7 = vmax.f32 %v183_v3, 0.0  ;;  %805 = vmatprep.mubr.msk.bf16.mxu0 %vm912_vm1, %v911_v43 }
  0xd6   :  { %v186_v8 = vpop.f32.mrf.mxu1  ;;  %791 = vmatprep.subr.bf16.mxu0 %v911_v43 }
  0xd7   :  { %v192_v9 = vmax.f32 %v185_v5, 0.0  ;;  %v195_v13 = vpack.c.bf16 %v191_v7, %v191_v7 }
  0xd8   :  { %v187_v10 = vpop.f32.mrf.mxu1 }
  0xd9   :  { %v196_v11 = vpack.c.bf16 %v192_v9, %v192_v9  ;;  %792 = vmatpush3.bf16.msra.mxu0 %v859_v6 }
  0xda   :  { %793 = vmatprep.subr.bf16.mxu0 %v911_v43 }
  0xdb   :  { %532 = vmatprep.mubr.bf16.mxu1 %v196_v11 }
  0xdc   :  { %533 = vmatmul.mubr.bf16.vlgmr.msra.gmra.mxu1 %v195_v13 }
  0xdd   :  { %794 = vmatpush3.bf16.msra.mxu0 %v860_v12 }
  0xde   :  { %795 = vmatprep.subr.bf16.mxu0 %v911_v43 }
  0xe1   :  { %796 = vmatpush3.bf16.msra.mxu0 %v861_v14 }
  0xe2   :  { %797 = vmatprep.subr.bf16.mxu0 %v911_v43 }
  0xe5   :  { %798 = vmatpush3.bf16.msra.mxu0 %v862_v15 }
  0xe6   :  { %799 = vmatprep.subr.bf16.mxu0 %v911_v43 }
  0xe9   :  { %800 = vmatpush3.bf16.msra.mxu0 %v863_v16 }
  0xea   :  { %801 = vmatprep.subr.bf16.mxu0 %v911_v43 }
  0xed   :  { %802 = vmatpush3.bf16.msra.mxu0 %v864_v17 }
  0xee   :  { %803 = vmatprep.subr.bf16.mxu0 %v911_v43 }
  0xf1   :  { %804 = vmatpush3.bf16.msra.mxu0 %v865_v18 }
 0x194   :  { %v752_v19 = vpop.f32.mrf.mxu0 }
 0x196   :  { %v753_v20 = vpop.f32.mrf.mxu0 }
 0x197   :  { %v754_v23 = vadd.f32 %v753_v20, %v752_v19 }
 0x198   :  { %v755_v21 = vpop.f32.mrf.mxu0 }
 0x199   :  { %v495_v27 = vadd.f32 %v754_v23, %v694_v24 }
 0x19a   :  { %v756_v22 = vpop.f32.mrf.mxu0 }
 0x19c   :  { %v774_v25 = vpop.f32.mrf.mxu1 }
 0x19e   :  { %v775_v26 = vpop.f32.mrf.mxu1 }
 0x19f   :  { %v776_v28 = vadd.f32 %v775_v26, %v774_v25 }
 0x1a0   :  { %v777_v29 = vpop.f32.mrf.mxu1 }
 0x1a1   :  { %v535_v30 = vadd.f32 %v776_v28, %v495_v27 }
 0x1a2   :  { %v778_v31 = vpop.f32.mrf.mxu1 }
 0x1a3   :  { %v540_v32 = vmax.f32 %v535_v30, 0.0 }
 0x1a5   :  { %v542_v33 = vpack.c.bf16 %v540_v32, %v540_v32  ;;  %541 = vst [vmem:[#allocation4] sm:$0xff] %v540_v32 }
 0x1a7   :  { %806 = vmatmul.mubr.bf16.vlgmr.msra.gmra.mxu0 %v542_v33 }
 0x1a8   :  { %877 = shalt.err (!%p874_p4)
}
 0x1a9   :  { %675 = dma.vmem_to_hbm [thread:$0]  %s673_s10, 128, %s1132_s8, [#allocation5]   ;;  %v727_v34 = vld [vmem:[%s1130_s6] ss:$0 sm:$0xff]  ;;  %vm654_vm2 = vcmask 80896  }
 0x1aa   :  { %s914_s15 = smov [#allocation2]  }
 0x1ab   :  { %s662_s16 = sshll.u32 %s914_s15, 4  ;;  %s663_s16 = int_to_ptr.vmem [resolvable:$true] %s662_s16 }
 0x1ac   :  { %s886_s17 = scalar_lea.vmem %s663_s16, 128  ;;  %p891_p6 = scmp.lt.s32.totalorder %s663_s16, %s663_s16 }
 0x1ad   :  { %p887_p5 = scmp.ne.s32.totalorder %s663_s16, %s886_s17  ;;  %p892_p7 = scmp.lt.s32.totalorder %s886_s17, %s886_s17 }
 0x1af   :  { %p893_p8 = por %p892_p7, %p891_p6 }
 0x1b1   :  { %p894_p9 = pnand %p893_p8, %p887_p5 }
 0x267   :  { %v648_v35 = vpop.f32.mrf.mxu0 }
 0x268   :  { %v649_v36 = vadd.f32 %v727_v34, %v648_v35 }
 0x269   :  { %v807_v37 = vpop.f32.mrf.mxu0 }
 0x26a   :  { %655 = vst.msk [vmem:[#allocation2] sm:$0xff] %vm654_vm2, %v649_v36 }
 0x26b   :  { %v651_v38 = vpop.f32.mrf.mxu0 }
 0x26c   :  { %897 = shalt.err (!%p894_p9)
}
 0x26d   :  { %665 = dma.vmem_to_hbm [thread:$0]  %s663_s16, 128, %s1131_s7, [#allocation3]   ;;  %v808_v39 = vpop.f32.mrf.mxu0 }
 0x26e   :  { %906 = dma.done.wait [#allocation3], 128  }
 0x26f   :  { %907 = vsyncadd [#allocation3], 4294967168 }
 0x270   :  { %908 = dma.done.wait [#allocation5], 128  }
 0x271   :  { %909 = vsyncadd [#allocation5], 4294967168 }
 0x272   :  { %682 = vsyncpa [#allocation3], 1 }
 0x273   :  { %683 = vsyncpa [#allocation5], 1 }

</bundles_post_ra>
